<compile_context>
chip_gen: v5e
topology: v5e:2x2
jax: 0.10.0
libtpu: 0.0.40
codegen_flags: <defaults>
</compile_context>

<pallas_src>
import functools

import jax
import jax.numpy as jnp
from jax import lax
from jax.experimental import pallas as pl
from jax.experimental.pallas import tpu as pltpu

EPS = 1e-5


def _mlp_fused_kernel(*refs):
    """Entire MLP forward in one kernel body.

    refs = (x_ref, [w, b, gamma, beta] * n_layers, o_ref), all fully VMEM
    resident (grid=(1,), block == full array). The Python loop over layers is
    statically unrolled at trace time.
    """
    x_ref, *layer_refs, o_ref = refs
    n_layers = len(layer_refs) // 4

    h = x_ref[...]                                         # (N, D0) f32
    for li in range(n_layers):
        w_ref, b_ref, g_ref, beta_ref = layer_refs[4 * li: 4 * li + 4]

        # Linear: single full-K MXU dot (K <= 512 fits trivially in VMEM).
        y = jnp.dot(h, w_ref[...], preferred_element_type=jnp.float32)
        y = y + b_ref[...]                                  # (N, Dj) + (1, Dj)

        # BatchNorm1d, training-mode batch statistics (biased variance),
        # var = E[y^2] - E[y]^2 (single pass; clamp guards FP cancellation).
        mean = jnp.mean(y, axis=0, keepdims=True)
        var = jnp.maximum(
            jnp.mean(y * y, axis=0, keepdims=True) - mean * mean, 0.0)
        y_hat = (y - mean) * lax.rsqrt(var + EPS)

        # Scale/shift + ReLU.
        h = jnp.maximum(g_ref[...] * y_hat + beta_ref[...], 0.0)

    o_ref[...] = h.astype(o_ref.dtype)


def mlp_pallas(x, params):
    """x: (N, D0) f32; params: list of (W[Din,Dout], b[1,Dout], gamma, beta)."""
    n, _ = x.shape
    # BN batch statistics require that no padded rows enter the reduction;
    # with grid=(1,) and block == full array this holds, but keep the layout
    # tile-friendly (f32 sublane tile is 8).
    assert n % 8 == 0, "batch must be a multiple of 8 (f32 sublane tile)"
    d_out_final = params[-1][0].shape[1]

    flat_args = [x]
    in_specs = [pl.BlockSpec(x.shape, lambda i: (0, 0))]
    for (w, b, gamma, beta) in params:
        for a in (w, b, gamma, beta):
            flat_args.append(a)
            in_specs.append(pl.BlockSpec(a.shape, lambda i: (0, 0)))

    return pl.pallas_call(
        _mlp_fused_kernel,
        out_shape=jax.ShapeDtypeStruct((n, d_out_final), jnp.float32),
        grid=(1,),
        in_specs=in_specs,
        out_specs=pl.BlockSpec((n, d_out_final), lambda i: (0, 0)),
        compiler_params=pltpu.CompilerParams(
            dimension_semantics=("arbitrary",),
        ),
    )(*flat_args)


def init_mlp_params(key, hidden_dim):
    """Deterministic params mimicking the PyTorch module's shapes."""
    params = []
    for i in range(len(hidden_dim) - 1):
        d_in, d_out = hidden_dim[i], hidden_dim[i + 1]
        key, kw, kb = jax.random.split(key, 3)
        bound = 1.0 / jnp.sqrt(d_in)
        # PyTorch nn.Linear stores (d_out, d_in); we keep it pre-transposed.
        w = jax.random.uniform(kw, (d_in, d_out), jnp.float32, -bound, bound)
        b = jax.random.uniform(kb, (1, d_out), jnp.float32, -bound, bound)
        gamma = jnp.ones((1, d_out), jnp.float32)   # BatchNorm1d defaults
        beta = jnp.zeros((1, d_out), jnp.float32)
        params.append((w, b, gamma, beta))
    return params


@jax.jit
def mlp_forward(x, params):
    x = x.astype(jnp.float32)          # x.float()
    return mlp_pallas(x, params)


if __name__ == "__main__":
    # Small but tile-friendly shapes consistent with the module:
    # MLP(hidden_dim=[256, 512, 128]), batch N = 16.
    hidden_dim = [256, 512, 128]
    n = 16

    key = jax.random.PRNGKey(0)
    key, kx = jax.random.split(key)
    x = jax.random.normal(kx, (n, hidden_dim[0]), jnp.float32)

    params = init_mlp_params(key, hidden_dim)

    out = mlp_forward(x, params)
    jax.block_until_ready(out)

    assert out.shape == (n, hidden_dim[-1])
    assert out.dtype == jnp.float32
    assert bool(jnp.all(out >= 0.0))   # ReLU output
    print("KERNEL_OK")
</pallas_src>

<mosaic_0001>
module attributes {stable_mosaic.version = 11 : i64} {
  func.func @_mlp_fused_kernel(%arg0: i32, %arg1: memref<16x256xf32, #tpu.memory_space<vmem>>, %arg2: memref<256x512xf32, #tpu.memory_space<vmem>>, %arg3: memref<1x512xf32, #tpu.memory_space<vmem>>, %arg4: memref<1x512xf32, #tpu.memory_space<vmem>>, %arg5: memref<1x512xf32, #tpu.memory_space<vmem>>, %arg6: memref<512x128xf32, #tpu.memory_space<vmem>>, %arg7: memref<1x128xf32, #tpu.memory_space<vmem>>, %arg8: memref<1x128xf32, #tpu.memory_space<vmem>>, %arg9: memref<1x128xf32, #tpu.memory_space<vmem>>, %arg10: memref<16x128xf32, #tpu.memory_space<vmem>>) attributes {dimension_semantics = [#tpu.dimension_semantics<arbitrary>], iteration_bounds = array<i64: 1>, scalar_prefetch = 0 : i64, scratch_operands = 0 : i64, tpu.core_type = #tpu.core_type<tc>, window_params = [{pipeline_mode = #tpu.pipeline_mode<synchronous>, transform_indices = @transform_0, window_bounds = array<i64: 16, 256>}, {pipeline_mode = #tpu.pipeline_mode<synchronous>, transform_indices = @transform_1, window_bounds = array<i64: 256, 512>}, {pipeline_mode = #tpu.pipeline_mode<synchronous>, transform_indices = @transform_2, window_bounds = array<i64: 1, 512>}, {pipeline_mode = #tpu.pipeline_mode<synchronous>, transform_indices = @transform_3, window_bounds = array<i64: 1, 512>}, {pipeline_mode = #tpu.pipeline_mode<synchronous>, transform_indices = @transform_4, window_bounds = array<i64: 1, 512>}, {pipeline_mode = #tpu.pipeline_mode<synchronous>, transform_indices = @transform_5, window_bounds = array<i64: 512, 128>}, {pipeline_mode = #tpu.pipeline_mode<synchronous>, transform_indices = @transform_6, window_bounds = array<i64: 1, 128>}, {pipeline_mode = #tpu.pipeline_mode<synchronous>, transform_indices = @transform_7, window_bounds = array<i64: 1, 128>}, {pipeline_mode = #tpu.pipeline_mode<synchronous>, transform_indices = @transform_8, window_bounds = array<i64: 1, 128>}, {pipeline_mode = #tpu.pipeline_mode<synchronous>, transform_indices = @transform_9, window_bounds = array<i64: 16, 128>}]} {
    %c0 = arith.constant 0 : index
    %c0_0 = arith.constant 0 : index
    %0 = vector.load %arg1[%c0, %c0_0] : memref<16x256xf32, #tpu.memory_space<vmem>>, vector<16x256xf32>
    %c0_1 = arith.constant 0 : index
    %c0_2 = arith.constant 0 : index
    %1 = vector.load %arg2[%c0_1, %c0_2] : memref<256x512xf32, #tpu.memory_space<vmem>>, vector<256x512xf32>
    %cst = arith.constant dense<0.000000e+00> : vector<16x512xf32>
    %2 = tpu.matmul %0, %1, %cst {dimension_numbers = #tpu.dot_dimension_numbers<[1], [0], [0], [1], [0, 0, 1, 1], [], []>} : vector<16x256xf32>, vector<256x512xf32>, vector<16x512xf32> -> vector<16x512xf32>
    %c0_3 = arith.constant 0 : index
    %c0_4 = arith.constant 0 : index
    %3 = vector.load %arg3[%c0_3, %c0_4] : memref<1x512xf32, #tpu.memory_space<vmem>>, vector<1x512xf32>
    %4 = vector.broadcast %3 : vector<1x512xf32> to vector<16x512xf32>
    %5 = arith.addf %2, %4 : vector<16x512xf32>
    %cst_5 = arith.constant dense<0.000000e+00> : vector<512xf32>
    %6 = vector.multi_reduction <add>, %5, %cst_5 [0] : vector<16x512xf32> to vector<512xf32>
    %7 = vector.shape_cast %6 : vector<512xf32> to vector<1x512xf32>
    %cst_6 = arith.constant 1.600000e+01 : f32
    %8 = vector.broadcast %cst_6 : f32 to vector<1x512xf32>
    %9 = arith.divf %7, %8 : vector<1x512xf32>
    %10 = arith.mulf %5, %5 : vector<16x512xf32>
    %cst_7 = arith.constant dense<0.000000e+00> : vector<512xf32>
    %11 = vector.multi_reduction <add>, %10, %cst_7 [0] : vector<16x512xf32> to vector<512xf32>
    %12 = vector.shape_cast %11 : vector<512xf32> to vector<1x512xf32>
    %cst_8 = arith.constant 1.600000e+01 : f32
    %13 = vector.broadcast %cst_8 : f32 to vector<1x512xf32>
    %14 = arith.divf %12, %13 : vector<1x512xf32>
    %15 = arith.mulf %9, %9 : vector<1x512xf32>
    %16 = arith.subf %14, %15 : vector<1x512xf32>
    %cst_9 = arith.constant 0.000000e+00 : f32
    %17 = vector.broadcast %cst_9 : f32 to vector<1x512xf32>
    %18 = arith.maximumf %16, %17 : vector<1x512xf32>
    %19 = vector.broadcast %9 : vector<1x512xf32> to vector<16x512xf32>
    %20 = arith.subf %5, %19 : vector<16x512xf32>
    %cst_10 = arith.constant 9.99999974E-6 : f32
    %21 = vector.broadcast %cst_10 : f32 to vector<1x512xf32>
    %22 = arith.addf %18, %21 : vector<1x512xf32>
    %23 = math.rsqrt %22 : vector<1x512xf32>
    %24 = vector.broadcast %23 : vector<1x512xf32> to vector<16x512xf32>
    %25 = arith.mulf %20, %24 : vector<16x512xf32>
    %c0_11 = arith.constant 0 : index
    %c0_12 = arith.constant 0 : index
    %26 = vector.load %arg4[%c0_11, %c0_12] : memref<1x512xf32, #tpu.memory_space<vmem>>, vector<1x512xf32>
    %27 = vector.broadcast %26 : vector<1x512xf32> to vector<16x512xf32>
    %28 = arith.mulf %27, %25 : vector<16x512xf32>
    %c0_13 = arith.constant 0 : index
    %c0_14 = arith.constant 0 : index
    %29 = vector.load %arg5[%c0_13, %c0_14] : memref<1x512xf32, #tpu.memory_space<vmem>>, vector<1x512xf32>
    %30 = vector.broadcast %29 : vector<1x512xf32> to vector<16x512xf32>
    %31 = arith.addf %28, %30 : vector<16x512xf32>
    %cst_15 = arith.constant 0.000000e+00 : f32
    %32 = vector.broadcast %cst_15 : f32 to vector<16x512xf32>
    %33 = arith.maximumf %31, %32 : vector<16x512xf32>
    %c0_16 = arith.constant 0 : index
    %c0_17 = arith.constant 0 : index
    %34 = vector.load %arg6[%c0_16, %c0_17] : memref<512x128xf32, #tpu.memory_space<vmem>>, vector<512x128xf32>
    %cst_18 = arith.constant dense<0.000000e+00> : vector<16x128xf32>
    %35 = tpu.matmul %33, %34, %cst_18 {dimension_numbers = #tpu.dot_dimension_numbers<[1], [0], [0], [1], [0, 0, 1, 1], [], []>} : vector<16x512xf32>, vector<512x128xf32>, vector<16x128xf32> -> vector<16x128xf32>
    %c0_19 = arith.constant 0 : index
    %c0_20 = arith.constant 0 : index
    %36 = vector.load %arg7[%c0_19, %c0_20] : memref<1x128xf32, #tpu.memory_space<vmem>>, vector<1x128xf32>
    %37 = vector.broadcast %36 : vector<1x128xf32> to vector<16x128xf32>
    %38 = arith.addf %35, %37 : vector<16x128xf32>
    %cst_21 = arith.constant dense<0.000000e+00> : vector<128xf32>
    %39 = vector.multi_reduction <add>, %38, %cst_21 [0] : vector<16x128xf32> to vector<128xf32>
    %40 = vector.shape_cast %39 : vector<128xf32> to vector<1x128xf32>
    %cst_22 = arith.constant 1.600000e+01 : f32
    %41 = vector.broadcast %cst_22 : f32 to vector<1x128xf32>
    %42 = arith.divf %40, %41 : vector<1x128xf32>
    %43 = arith.mulf %38, %38 : vector<16x128xf32>
    %cst_23 = arith.constant dense<0.000000e+00> : vector<128xf32>
    %44 = vector.multi_reduction <add>, %43, %cst_23 [0] : vector<16x128xf32> to vector<128xf32>
    %45 = vector.shape_cast %44 : vector<128xf32> to vector<1x128xf32>
    %cst_24 = arith.constant 1.600000e+01 : f32
    %46 = vector.broadcast %cst_24 : f32 to vector<1x128xf32>
    %47 = arith.divf %45, %46 : vector<1x128xf32>
    %48 = arith.mulf %42, %42 : vector<1x128xf32>
    %49 = arith.subf %47, %48 : vector<1x128xf32>
    %cst_25 = arith.constant 0.000000e+00 : f32
    %50 = vector.broadcast %cst_25 : f32 to vector<1x128xf32>
    %51 = arith.maximumf %49, %50 : vector<1x128xf32>
    %52 = vector.broadcast %42 : vector<1x128xf32> to vector<16x128xf32>
    %53 = arith.subf %38, %52 : vector<16x128xf32>
    %cst_26 = arith.constant 9.99999974E-6 : f32
    %54 = vector.broadcast %cst_26 : f32 to vector<1x128xf32>
    %55 = arith.addf %51, %54 : vector<1x128xf32>
    %56 = math.rsqrt %55 : vector<1x128xf32>
    %57 = vector.broadcast %56 : vector<1x128xf32> to vector<16x128xf32>
    %58 = arith.mulf %53, %57 : vector<16x128xf32>
    %c0_27 = arith.constant 0 : index
    %c0_28 = arith.constant 0 : index
    %59 = vector.load %arg8[%c0_27, %c0_28] : memref<1x128xf32, #tpu.memory_space<vmem>>, vector<1x128xf32>
    %60 = vector.broadcast %59 : vector<1x128xf32> to vector<16x128xf32>
    %61 = arith.mulf %60, %58 : vector<16x128xf32>
    %c0_29 = arith.constant 0 : index
    %c0_30 = arith.constant 0 : index
    %62 = vector.load %arg9[%c0_29, %c0_30] : memref<1x128xf32, #tpu.memory_space<vmem>>, vector<1x128xf32>
    %63 = vector.broadcast %62 : vector<1x128xf32> to vector<16x128xf32>
    %64 = arith.addf %61, %63 : vector<16x128xf32>
    %cst_31 = arith.constant 0.000000e+00 : f32
    %65 = vector.broadcast %cst_31 : f32 to vector<16x128xf32>
    %66 = arith.maximumf %64, %65 : vector<16x128xf32>
    %c0_32 = arith.constant 0 : index
    %c0_33 = arith.constant 0 : index
    %67 = vector.load %arg10[%c0_32, %c0_33] : memref<16x128xf32, #tpu.memory_space<vmem>>, vector<16x128xf32>
    tpu.vector_store %arg10[%c0_32, %c0_33], %66 {strides = array<i32>} : memref<16x128xf32, #tpu.memory_space<vmem>>, vector<16x128xf32>,
    return
  }
  func.func @transform_0(%arg0: i32) -> (i32, i32) {
    %c0_i32 = arith.constant 0 : i32
    %c0_i32_0 = arith.constant 0 : i32
    %c0_i32_1 = arith.constant 0 : i32
    return %c0_i32, %c0_i32_0 : i32, i32
  }
  func.func @transform_1(%arg0: i32) -> (i32, i32) {
    %c0_i32 = arith.constant 0 : i32
    %c0_i32_0 = arith.constant 0 : i32
    %c0_i32_1 = arith.constant 0 : i32
    return %c0_i32, %c0_i32_0 : i32, i32
  }
  func.func @transform_2(%arg0: i32) -> (i32, i32) {
    %c0_i32 = arith.constant 0 : i32
    %c0_i32_0 = arith.constant 0 : i32
    %c0_i32_1 = arith.constant 0 : i32
    return %c0_i32, %c0_i32_0 : i32, i32
  }
  func.func @transform_3(%arg0: i32) -> (i32, i32) {
    %c0_i32 = arith.constant 0 : i32
    %c0_i32_0 = arith.constant 0 : i32
    %c0_i32_1 = arith.constant 0 : i32
    return %c0_i32, %c0_i32_0 : i32, i32
  }
  func.func @transform_4(%arg0: i32) -> (i32, i32) {
    %c0_i32 = arith.constant 0 : i32
    %c0_i32_0 = arith.constant 0 : i32
    %c0_i32_1 = arith.constant 0 : i32
    return %c0_i32, %c0_i32_0 : i32, i32
  }
  func.func @transform_5(%arg0: i32) -> (i32, i32) {
    %c0_i32 = arith.constant 0 : i32
    %c0_i32_0 = arith.constant 0 : i32
    %c0_i32_1 = arith.constant 0 : i32
    return %c0_i32, %c0_i32_0 : i32, i32
  }
  func.func @transform_6(%arg0: i32) -> (i32, i32) {
    %c0_i32 = arith.constant 0 : i32
    %c0_i32_0 = arith.constant 0 : i32
    %c0_i32_1 = arith.constant 0 : i32
    return %c0_i32, %c0_i32_0 : i32, i32
  }
  func.func @transform_7(%arg0: i32) -> (i32, i32) {
    %c0_i32 = arith.constant 0 : i32
    %c0_i32_0 = arith.constant 0 : i32
    %c0_i32_1 = arith.constant 0 : i32
    return %c0_i32, %c0_i32_0 : i32, i32
  }
  func.func @transform_8(%arg0: i32) -> (i32, i32) {
    %c0_i32 = arith.constant 0 : i32
    %c0_i32_0 = arith.constant 0 : i32
    %c0_i32_1 = arith.constant 0 : i32
    return %c0_i32, %c0_i32_0 : i32, i32
  }
  func.func @transform_9(%arg0: i32) -> (i32, i32) {
    %c0_i32 = arith.constant 0 : i32
    %c0_i32_0 = arith.constant 0 : i32
    %c0_i32_1 = arith.constant 0 : i32
    return %c0_i32, %c0_i32_0 : i32, i32
  }
}

</mosaic_0001>

<bundles_post_ra>
// kernel: mlp_forward.1
= control target key start
LH: loop header
LB: loop body
LE: loop exit
PB: predicated region body
PF: predicated region fallthrough
CT: control target
= control target key end

     0   :  { %14 = vsyncpa [#allocation3], 0  ;;  %s1348_s0 = inlined_call_operand.hbm [shape: f32[16,256], index: 0, kind: input, shape index: {}]   ;;  %s1349_s1 = inlined_call_operand.hbm [shape: f32[256,512], index: 1, kind: input, shape index: {}]   ;;  %s1350_s2 = inlined_call_operand.hbm [shape: f32[1,512], index: 2, kind: input, shape index: {}]   ;;  %s1351_s3 = inlined_call_operand.hbm [shape: f32[1,512], index: 3, kind: input, shape index: {}]   ;;  %s1352_s4 = inlined_call_operand.hbm [shape: f32[1,512], index: 4, kind: input, shape index: {}]   ;;  %s1353_s5 = inlined_call_operand.hbm [shape: f32[512,128], index: 5, kind: input, shape index: {}]   ;;  %s1354_s6 = inlined_call_operand.vmem [shape: f32[1,128], index: 6, kind: input, shape index: {}]   ;;  %s1355_s7 = inlined_call_operand.vmem [shape: f32[1,128], index: 7, kind: input, shape index: {}]   ;;  %s1356_s8 = inlined_call_operand.vmem [shape: f32[1,128], index: 8, kind: input, shape index: {}]   ;;  %s1357_s9 = inlined_call_operand.hbm [shape: f32[16,128], index: 9, kind: output, shape index: {}]  }
   0x1   :  { %15 = vsyncpa [#allocation6], 0 }
   0x2   :  { %16 = vsyncpa [#allocation9], 0 }
   0x3   :  { %17 = vsyncpa [#allocation12], 0  ;;  %s36_s11 = sshll.u32 %s1349_s1, 4  ;;  %s37_s11 = int_to_ptr.hbm [resolvable:$true] %s36_s11 }
   0x4   :  { %18 = vsyncpa [#allocation4], 0  ;;  %s1083_s12 = smov [#allocation5]   ;;  %s61_s16 = sshll.u32 %s1351_s3, 4  ;;  %s62_s16 = int_to_ptr.hbm [resolvable:$true] %s61_s16 }
   0x5   :  { %s38_s13 = sshll.u32 %s1083_s12, 4  ;;  %s1084_s17 = smov 512   ;;  %s39_s13 = int_to_ptr.vmem [resolvable:$true] %s38_s13 }
   0x6   :  { %s1085_s18 = smov 32   ;;  %s1086_s19 = smov [#allocation8]  }
   0x7   :  { %44 = dma.hbm_to_vmem [thread:$0]  %s37_s11, 16384, %s39_s13, [#allocation6], %s1084_s17, %s1084_s17, %s1085_s18  }
   0x8   :  { %s63_s20 = sshll.u32 %s1086_s19, 4  ;;  %s23_s23 = sshll.u32 %s1348_s0, 4  ;;  %s64_s20 = int_to_ptr.vmem [resolvable:$true] %s63_s20  ;;  %s24_s23 = int_to_ptr.hbm [resolvable:$true] %s23_s23 }
   0x9   :  { %66 = dma.hbm_to_vmem [thread:$0]  %s62_s16, 64, %s64_s20, [#allocation9]  }
   0xa   :  { %s1087_s1 = smov [#allocation2]   ;;  %s50_s3 = sshll.u32 %s1350_s2, 4  ;;  %s51_s3 = int_to_ptr.hbm [resolvable:$true] %s50_s3 }
   0xb   :  { %s25_s24 = sshll.u32 %s1087_s1, 4  ;;  %s1088_s27 = smov 256   ;;  %s26_s24 = int_to_ptr.vmem [resolvable:$true] %s25_s24 }
   0xc   :  { %s1089_s28 = smov 16   ;;  %s1090_s29 = smov [#allocation7]  }
   0xd   :  { %31 = dma.hbm_to_vmem [thread:$0]  %s24_s23, 512, %s26_s24, [#allocation3], %s1088_s27, %s1088_s27, %s1089_s28  }
   0xe   :  { %s52_s30 = sshll.u32 %s1090_s29, 4  ;;  %s72_s0 = sshll.u32 %s1352_s4, 4  ;;  %s53_s30 = int_to_ptr.vmem [resolvable:$true] %s52_s30  ;;  %s73_s0 = int_to_ptr.hbm [resolvable:$true] %s72_s0 }
   0xf   :  { %55 = dma.hbm_to_vmem [thread:$0]  %s51_s3, 64, %s53_s30, [#allocation6]  }
  0x10   :  { %s82_s14 = sshll.u32 %s1353_s5, 4  ;;  %s1091_s15 = smov [#allocation10]   ;;  %s83_s14 = int_to_ptr.hbm [resolvable:$true] %s82_s14 }
  0x11   :  { %s74_s16 = sshll.u32 %s1091_s15, 4  ;;  %s1092_s2 = smov [#allocation11]   ;;  %s75_s16 = int_to_ptr.vmem [resolvable:$true] %s74_s16 }
  0x12   :  { %77 = dma.hbm_to_vmem [thread:$0]  %s73_s0, 64, %s75_s16, [#allocation9]  }
  0x13   :  { %s84_s17 = sshll.u32 %s1092_s2, 4  ;;  %s1093_s18 = smov 128   ;;  %s85_s17 = int_to_ptr.vmem [resolvable:$true] %s84_s17 }
  0x14   :  { %s1094_s19 = smov 8  }
  0x15   :  { %90 = dma.hbm_to_vmem [thread:$0]  %s83_s14, 8192, %s85_s17, [#allocation12], %s1093_s18, %s1093_s18, %s1094_s19  }
  0x16   :  { %1073 = dma.done.wait [#allocation3], 512  }
  0x17   :  { %1074 = vsyncadd [#allocation3], 4294966784 }
  0x18   :  { %1075 = dma.done.wait [#allocation6], 16448  }
  0x19   :  { %1076 = vsyncadd [#allocation6], 4294950848 }
  0x1a   :  { %1077 = dma.done.wait [#allocation9], 128  }
  0x1b   :  { %1078 = vsyncadd [#allocation9], 4294967168 }
  0x1c   :  { %1079 = dma.done.wait [#allocation12], 8192  }
  0x1d   :  { %1080 = vsyncadd [#allocation12], 4294959104  ;;  %v185_v0 = vld [vmem:[#allocation5 + $0x1e0] sm:$0xff]  ;;  %v186_v1 = vld [vmem:[#allocation5 + $0x1e8] sm:$0xff]  ;;  %s1096_s23 = smov [#allocation13]   ;;  %s860_s26 = sshll.u32 %s1357_s9, 4  ;;  %s861_s26 = int_to_ptr.hbm [resolvable:$true] %s860_s26 }
  0x1e   :  { %v181_v2 = vld [vmem:[#allocation5 + $0x1c0] sm:$0xff]  ;;  %263 = vmatpush.msra.mxu0 %v185_v0  ;;  %309 = vmatpush.msra.mxu2 %v186_v1  ;;  %v182_v4 = vld [vmem:[#allocation5 + $0x1c8] sm:$0xff]  ;;  %v187_v63 = vld [vmem:[#allocation5 + $0x1f0] sm:$0xff]  ;;  %s858_s1 = sshll.u32 %s1096_s23, 4  ;;  %s859_s1 = int_to_ptr.vmem [resolvable:$true] %s858_s1 }
  0x1f   :  { %v249_v3 = vld [vmem:[#allocation5 + $0x3e0] sm:$0xff]  ;;  %v250_v5 = vld [vmem:[#allocation5 + $0x3e8] sm:$0xff]  ;;  %v188_v0 = vld [vmem:[#allocation5 + $0x1f8] sm:$0xff] }
  0x20   :  { %286 = vmatpush.msra.mxu1 %v249_v3  ;;  %332 = vmatpush.msra.mxu3 %v250_v5  ;;  %v177_v6 = vld [vmem:[#allocation5 + $0x1a0] sm:$0xff]  ;;  %v178_v8 = vld [vmem:[#allocation5 + $0x1a8] sm:$0xff]  ;;  %v251_v5 = vld [vmem:[#allocation5 + $0x3f0] sm:$0xff] }
  0x21   :  { %v245_v7 = vld [vmem:[#allocation5 + $0x3c0] sm:$0xff]  ;;  %264 = vmatpush.msra.mxu0 %v181_v2  ;;  %310 = vmatpush.msra.mxu2 %v182_v4  ;;  %v246_v9 = vld [vmem:[#allocation5 + $0x3c8] sm:$0xff]  ;;  %v183_v4 = vld [vmem:[#allocation5 + $0x1d0] sm:$0xff] }
  0x22   :  { %v241_v10 = vld [vmem:[#allocation5 + $0x3a0] sm:$0xff]  ;;  %287 = vmatpush.msra.mxu1 %v245_v7  ;;  %333 = vmatpush.msra.mxu3 %v246_v9  ;;  %v174_v12 = vld [vmem:[#allocation5 + $0x188] sm:$0xff]  ;;  %v252_v7 = vld [vmem:[#allocation5 + $0x3f8] sm:$0xff] }
  0x23   :  { %v173_v11 = vld [vmem:[#allocation5 + $0x180] sm:$0xff]  ;;  %v242_v13 = vld [vmem:[#allocation5 + $0x3a8] sm:$0xff]  ;;  %265 = vmatpush.msra.mxu0 %v177_v6  ;;  %311 = vmatpush.msra.mxu2 %v178_v8  ;;  %v184_v6 = vld [vmem:[#allocation5 + $0x1d8] sm:$0xff] }
  0x24   :  { %v237_v14 = vld [vmem:[#allocation5 + $0x380] sm:$0xff]  ;;  %v238_v15 = vld [vmem:[#allocation5 + $0x388] sm:$0xff]  ;;  %288 = vmatpush.msra.mxu1 %v241_v10  ;;  %334 = vmatpush.msra.mxu3 %v242_v13  ;;  %v179_v8 = vld [vmem:[#allocation5 + $0x1b0] sm:$0xff] }
  0x25   :  { %v169_v16 = vld [vmem:[#allocation5 + $0x160] sm:$0xff]  ;;  %v170_v17 = vld [vmem:[#allocation5 + $0x168] sm:$0xff]  ;;  %266 = vmatpush.msra.mxu0 %v173_v11  ;;  %312 = vmatpush.msra.mxu2 %v174_v12  ;;  %v247_v9 = vld [vmem:[#allocation5 + $0x3d0] sm:$0xff] }
  0x26   :  { %v233_v18 = vld [vmem:[#allocation5 + $0x360] sm:$0xff]  ;;  %v234_v19 = vld [vmem:[#allocation5 + $0x368] sm:$0xff]  ;;  %289 = vmatpush.msra.mxu1 %v237_v14  ;;  %335 = vmatpush.msra.mxu3 %v238_v15  ;;  %v180_v10 = vld [vmem:[#allocation5 + $0x1b8] sm:$0xff] }
  0x27   :  { %v165_v20 = vld [vmem:[#allocation5 + $0x140] sm:$0xff]  ;;  %v166_v21 = vld [vmem:[#allocation5 + $0x148] sm:$0xff]  ;;  %267 = vmatpush.msra.mxu0 %v169_v16  ;;  %313 = vmatpush.msra.mxu2 %v170_v17  ;;  %v248_v11 = vld [vmem:[#allocation5 + $0x3d8] sm:$0xff] }
  0x28   :  { %v229_v22 = vld [vmem:[#allocation5 + $0x340] sm:$0xff]  ;;  %v230_v23 = vld [vmem:[#allocation5 + $0x348] sm:$0xff]  ;;  %290 = vmatpush.msra.mxu1 %v233_v18  ;;  %336 = vmatpush.msra.mxu3 %v234_v19  ;;  %v175_v12 = vld [vmem:[#allocation5 + $0x190] sm:$0xff] }
  0x29   :  { %v161_v24 = vld [vmem:[#allocation5 + $0x120] sm:$0xff]  ;;  %v162_v25 = vld [vmem:[#allocation5 + $0x128] sm:$0xff]  ;;  %268 = vmatpush.msra.mxu0 %v165_v20  ;;  %314 = vmatpush.msra.mxu2 %v166_v21  ;;  %v243_v13 = vld [vmem:[#allocation5 + $0x3b0] sm:$0xff] }
  0x2a   :  { %v225_v26 = vld [vmem:[#allocation5 + $0x320] sm:$0xff]  ;;  %v226_v27 = vld [vmem:[#allocation5 + $0x328] sm:$0xff]  ;;  %291 = vmatpush.msra.mxu1 %v229_v22  ;;  %337 = vmatpush.msra.mxu3 %v230_v23  ;;  %v176_v14 = vld [vmem:[#allocation5 + $0x198] sm:$0xff] }
  0x2b   :  { %v157_v28 = vld [vmem:[#allocation5 + $0x100] sm:$0xff]  ;;  %v158_v29 = vld [vmem:[#allocation5 + $0x108] sm:$0xff]  ;;  %269 = vmatpush.msra.mxu0 %v161_v24  ;;  %315 = vmatpush.msra.mxu2 %v162_v25  ;;  %v244_v15 = vld [vmem:[#allocation5 + $0x3b8] sm:$0xff] }
  0x2c   :  { %v221_v30 = vld [vmem:[#allocation5 + $0x300] sm:$0xff]  ;;  %v222_v31 = vld [vmem:[#allocation5 + $0x308] sm:$0xff]  ;;  %292 = vmatpush.msra.mxu1 %v225_v26  ;;  %338 = vmatpush.msra.mxu3 %v226_v27  ;;  %v1176_v16 = vld [vmem:[#allocation2 + $0x10] sm:$0xff] }
  0x2d   :  { %v153_v32 = vld [vmem:[#allocation5 + $0xe0] sm:$0xff]  ;;  %v154_v33 = vld [vmem:[#allocation5 + $0xe8] sm:$0xff]  ;;  %270 = vmatpush.msra.mxu0 %v157_v28  ;;  %316 = vmatpush.msra.mxu2 %v158_v29  ;;  %v171_v17 = vld [vmem:[#allocation5 + $0x170] sm:$0xff] }
  0x2e   :  { %v217_v34 = vld [vmem:[#allocation5 + $0x2e0] sm:$0xff]  ;;  %v218_v35 = vld [vmem:[#allocation5 + $0x2e8] sm:$0xff]  ;;  %293 = vmatpush.msra.mxu1 %v221_v30  ;;  %339 = vmatpush.msra.mxu3 %v222_v31  ;;  %v239_v18 = vld [vmem:[#allocation5 + $0x390] sm:$0xff] }
  0x2f   :  { %v149_v36 = vld [vmem:[#allocation5 + $0xc0] sm:$0xff]  ;;  %v150_v37 = vld [vmem:[#allocation5 + $0xc8] sm:$0xff]  ;;  %271 = vmatpush.msra.mxu0 %v153_v32  ;;  %317 = vmatpush.msra.mxu2 %v154_v33  ;;  %v172_v19 = vld [vmem:[#allocation5 + $0x178] sm:$0xff] }
  0x30   :  { %v213_v38 = vld [vmem:[#allocation5 + $0x2c0] sm:$0xff]  ;;  %v214_v39 = vld [vmem:[#allocation5 + $0x2c8] sm:$0xff]  ;;  %294 = vmatpush.msra.mxu1 %v217_v34  ;;  %340 = vmatpush.msra.mxu3 %v218_v35  ;;  %v240_v20 = vld [vmem:[#allocation5 + $0x398] sm:$0xff] }
  0x31   :  { %v145_v40 = vld [vmem:[#allocation5 + $0xa0] sm:$0xff]  ;;  %v146_v41 = vld [vmem:[#allocation5 + $0xa8] sm:$0xff]  ;;  %272 = vmatpush.msra.mxu0 %v149_v36  ;;  %318 = vmatpush.msra.mxu2 %v150_v37  ;;  %v1180_v21 = vld [vmem:[#allocation2 + $0x18] sm:$0xff] }
  0x32   :  { %v209_v42 = vld [vmem:[#allocation5 + $0x2a0] sm:$0xff]  ;;  %v210_v43 = vld [vmem:[#allocation5 + $0x2a8] sm:$0xff]  ;;  %295 = vmatpush.msra.mxu1 %v213_v38  ;;  %341 = vmatpush.msra.mxu3 %v214_v39  ;;  %v167_v22 = vld [vmem:[#allocation5 + $0x150] sm:$0xff] }
  0x33   :  { %v141_v44 = vld [vmem:[#allocation5 + $0x80] sm:$0xff]  ;;  %v142_v45 = vld [vmem:[#allocation5 + $0x88] sm:$0xff]  ;;  %273 = vmatpush.msra.mxu0 %v145_v40  ;;  %319 = vmatpush.msra.mxu2 %v146_v41  ;;  %v235_v23 = vld [vmem:[#allocation5 + $0x370] sm:$0xff] }
  0x34   :  { %v205_v46 = vld [vmem:[#allocation5 + $0x280] sm:$0xff]  ;;  %v206_v47 = vld [vmem:[#allocation5 + $0x288] sm:$0xff]  ;;  %296 = vmatpush.msra.mxu1 %v209_v42  ;;  %342 = vmatpush.msra.mxu3 %v210_v43  ;;  %v168_v24 = vld [vmem:[#allocation5 + $0x158] sm:$0xff] }
  0x35   :  { %v137_v48 = vld [vmem:[#allocation5 + $0x60] sm:$0xff]  ;;  %v138_v49 = vld [vmem:[#allocation5 + $0x68] sm:$0xff]  ;;  %274 = vmatpush.msra.mxu0 %v141_v44  ;;  %320 = vmatpush.msra.mxu2 %v142_v45  ;;  %v236_v25 = vld [vmem:[#allocation5 + $0x378] sm:$0xff] }
  0x36   :  { %v201_v50 = vld [vmem:[#allocation5 + $0x260] sm:$0xff]  ;;  %v202_v51 = vld [vmem:[#allocation5 + $0x268] sm:$0xff]  ;;  %297 = vmatpush.msra.mxu1 %v205_v46  ;;  %343 = vmatpush.msra.mxu3 %v206_v47  ;;  %v163_v26 = vld [vmem:[#allocation5 + $0x130] sm:$0xff] }
  0x37   :  { %v133_v52 = vld [vmem:[#allocation5 + $0x40] sm:$0xff]  ;;  %v134_v53 = vld [vmem:[#allocation5 + $0x48] sm:$0xff]  ;;  %275 = vmatpush.msra.mxu0 %v137_v48  ;;  %321 = vmatpush.msra.mxu2 %v138_v49  ;;  %v231_v27 = vld [vmem:[#allocation5 + $0x350] sm:$0xff] }
  0x38   :  { %v197_v54 = vld [vmem:[#allocation5 + $0x240] sm:$0xff]  ;;  %v198_v55 = vld [vmem:[#allocation5 + $0x248] sm:$0xff]  ;;  %298 = vmatpush.msra.mxu1 %v201_v50  ;;  %344 = vmatpush.msra.mxu3 %v202_v51  ;;  %v164_v28 = vld [vmem:[#allocation5 + $0x138] sm:$0xff] }
  0x39   :  { %v129_v56 = vld [vmem:[#allocation5 + $0x20] sm:$0xff]  ;;  %v130_v57 = vld [vmem:[#allocation5 + $0x28] sm:$0xff]  ;;  %276 = vmatpush.msra.mxu0 %v133_v52  ;;  %322 = vmatpush.msra.mxu2 %v134_v53  ;;  %v232_v29 = vld [vmem:[#allocation5 + $0x358] sm:$0xff] }
  0x3a   :  { %v193_v58 = vld [vmem:[#allocation5 + $0x220] sm:$0xff]  ;;  %v194_v59 = vld [vmem:[#allocation5 + $0x228] sm:$0xff]  ;;  %299 = vmatpush.msra.mxu1 %v197_v54  ;;  %345 = vmatpush.msra.mxu3 %v198_v55  ;;  %v159_v30 = vld [vmem:[#allocation5 + $0x110] sm:$0xff] }
  0x3b   :  { %v125_v60 = vld [vmem:[#allocation5] sm:$0xff]  ;;  %v126_v61 = vld [vmem:[#allocation5 + $0x8] sm:$0xff]  ;;  %277 = vmatpush.msra.mxu0 %v129_v56  ;;  %323 = vmatpush.msra.mxu2 %v130_v57  ;;  %v227_v31 = vld [vmem:[#allocation5 + $0x330] sm:$0xff] }
  0x3c   :  { %v1168_v62 = vld [vmem:[#allocation2] sm:$0xff]  ;;  %300 = vmatpush.msra.mxu1 %v193_v58  ;;  %346 = vmatpush.msra.mxu3 %v194_v59  ;;  %v190_v2 = vld [vmem:[#allocation5 + $0x208] sm:$0xff]  ;;  %v160_v32 = vld [vmem:[#allocation5 + $0x118] sm:$0xff] }
  0x3d   :  { %278 = vmatpush.msra.mxu0 %v125_v60  ;;  %324 = vmatpush.msra.mxu2 %v126_v61  ;;  %v189_v1 = vld [vmem:[#allocation5 + $0x200] sm:$0xff]  ;;  %v1172_v3 = vld [vmem:[#allocation2 + $0x8] sm:$0xff]  ;;  %v228_v33 = vld [vmem:[#allocation5 + $0x338] sm:$0xff] }
  0x3e   :  { %279 = vmatmul.f32.vlgmr.msra.gmra.mxu0 %v1168_v62  ;;  %325 = vmatmul.f32.vlgmr.msra.gmra.mxu2 %v1168_v62  ;;  %v155_v34 = vld [vmem:[#allocation5 + $0xf0] sm:$0xff]  ;;  %v156_v36 = vld [vmem:[#allocation5 + $0xf8] sm:$0xff] }
  0x3f   :  { %355 = vmatpush.msrb.mxu0 %v187_v63  ;;  %401 = vmatpush.msrb.mxu2 %v188_v0  ;;  %v223_v35 = vld [vmem:[#allocation5 + $0x310] sm:$0xff]  ;;  %v224_v37 = vld [vmem:[#allocation5 + $0x318] sm:$0xff] }
  0x40   :  { %301 = vmatpush.msra.mxu1 %v189_v1  ;;  %347 = vmatpush.msra.mxu3 %v190_v2  ;;  %v151_v38 = vld [vmem:[#allocation5 + $0xd0] sm:$0xff]  ;;  %v152_v40 = vld [vmem:[#allocation5 + $0xd8] sm:$0xff] }
  0x41   :  { %302 = vmatmul.f32.vlgmr.msra.gmra.mxu1 %v1172_v3  ;;  %348 = vmatmul.f32.vlgmr.msra.gmra.mxu3 %v1172_v3  ;;  %v219_v39 = vld [vmem:[#allocation5 + $0x2f0] sm:$0xff]  ;;  %v220_v41 = vld [vmem:[#allocation5 + $0x2f8] sm:$0xff] }
  0x42   :  { %356 = vmatpush.msrb.mxu0 %v183_v4  ;;  %378 = vmatpush.msrb.mxu1 %v251_v5  ;;  %v147_v42 = vld [vmem:[#allocation5 + $0xb0] sm:$0xff]  ;;  %v148_v44 = vld [vmem:[#allocation5 + $0xb8] sm:$0xff] }
  0x43   :  { %402 = vmatpush.msrb.mxu2 %v184_v6  ;;  %424 = vmatpush.msrb.mxu3 %v252_v7  ;;  %v215_v43 = vld [vmem:[#allocation5 + $0x2d0] sm:$0xff]  ;;  %v216_v45 = vld [vmem:[#allocation5 + $0x2d8] sm:$0xff]  ;;  %v1192_v6 = vld [vmem:[#allocation7] sm:$0xf] }
  0x44   :  { %357 = vmatpush.msrb.mxu0 %v179_v8  ;;  %379 = vmatpush.msrb.mxu1 %v247_v9  ;;  %v143_v46 = vld [vmem:[#allocation5 + $0x90] sm:$0xff]  ;;  %v144_v48 = vld [vmem:[#allocation5 + $0x98] sm:$0xff]  ;;  %v255_v8 = vperm.slane %v1192_v6, 0 }
  0x45   :  { %403 = vmatpush.msrb.mxu2 %v180_v10  ;;  %425 = vmatpush.msrb.mxu3 %v248_v11  ;;  %v211_v47 = vld [vmem:[#allocation5 + $0x2b0] sm:$0xff]  ;;  %v212_v49 = vld [vmem:[#allocation5 + $0x2b8] sm:$0xff]  ;;  %v657_v10 = vld [vmem:[#allocation11 + $0x78] sm:$0xff] }
  0x46   :  { %358 = vmatpush.msrb.mxu0 %v175_v12  ;;  %380 = vmatpush.msrb.mxu1 %v243_v13  ;;  %v139_v50 = vld [vmem:[#allocation5 + $0x70] sm:$0xff]  ;;  %v140_v52 = vld [vmem:[#allocation5 + $0x78] sm:$0xff] }
  0x47   :  { %404 = vmatpush.msrb.mxu2 %v176_v14  ;;  %426 = vmatpush.msrb.mxu3 %v244_v15  ;;  %v207_v51 = vld [vmem:[#allocation5 + $0x290] sm:$0xff]  ;;  %v208_v53 = vld [vmem:[#allocation5 + $0x298] sm:$0xff]  ;;  %v256_v14 = vperm.slane %v1192_v6, 1 }
  0x48   :  { %282 = vmatmul.f32.gmra.mxu0 %v1176_v16  ;;  %328 = vmatmul.f32.gmra.mxu2 %v1176_v16  ;;  %v135_v54 = vld [vmem:[#allocation5 + $0x50] sm:$0xff]  ;;  %v136_v56 = vld [vmem:[#allocation5 + $0x58] sm:$0xff] }
  0x49   :  { %359 = vmatpush.msrb.mxu0 %v171_v17  ;;  %381 = vmatpush.msrb.mxu1 %v239_v18  ;;  %v203_v55 = vld [vmem:[#allocation5 + $0x270] sm:$0xff]  ;;  %v204_v57 = vld [vmem:[#allocation5 + $0x278] sm:$0xff] }
  0x4a   :  { %405 = vmatpush.msrb.mxu2 %v172_v19  ;;  %427 = vmatpush.msrb.mxu3 %v240_v20  ;;  %v131_v58 = vld [vmem:[#allocation5 + $0x30] sm:$0xff]  ;;  %v132_v60 = vld [vmem:[#allocation5 + $0x38] sm:$0xff]  ;;  %v673_v20 = vld [vmem:[#allocation11 + $0xf8] sm:$0xff] }
  0x4b   :  { %305 = vmatmul.f32.gmra.mxu1 %v1180_v21  ;;  %351 = vmatmul.f32.gmra.mxu3 %v1180_v21  ;;  %v199_v59 = vld [vmem:[#allocation5 + $0x250] sm:$0xff]  ;;  %v200_v61 = vld [vmem:[#allocation5 + $0x258] sm:$0xff] }
  0x4c   :  { %360 = vmatpush.msrb.mxu0 %v167_v22  ;;  %382 = vmatpush.msrb.mxu1 %v235_v23  ;;  %v127_v63 = vld [vmem:[#allocation5 + $0x10] sm:$0xff]  ;;  %v128_v1 = vld [vmem:[#allocation5 + $0x18] sm:$0xff] }
  0x4d   :  { %406 = vmatpush.msrb.mxu2 %v168_v24  ;;  %428 = vmatpush.msrb.mxu3 %v236_v25  ;;  %v195_v0 = vld [vmem:[#allocation5 + $0x230] sm:$0xff]  ;;  %v196_v2 = vld [vmem:[#allocation5 + $0x238] sm:$0xff]  ;;  %v653_v24 = vld [vmem:[#allocation11 + $0x58] sm:$0xff] }
  0x4e   :  { %361 = vmatpush.msrb.mxu0 %v163_v26  ;;  %383 = vmatpush.msrb.mxu1 %v231_v27  ;;  %v191_v4 = vld [vmem:[#allocation5 + $0x210] sm:$0xff]  ;;  %v192_v5 = vld [vmem:[#allocation5 + $0x218] sm:$0xff] }
  0x4f   :  { %407 = vmatpush.msrb.mxu2 %v164_v28  ;;  %429 = vmatpush.msrb.mxu3 %v232_v29  ;;  %v656_v12 = vld [vmem:[#allocation11 + $0x70] sm:$0xff]  ;;  %v655_v15 = vld [vmem:[#allocation11 + $0x68] sm:$0xff]  ;;  %v654_v19 = vld [vmem:[#allocation11 + $0x60] sm:$0xff] }
  0x50   :  { %362 = vmatpush.msrb.mxu0 %v159_v30  ;;  %384 = vmatpush.msrb.mxu1 %v227_v31  ;;  %v672_v25 = vld [vmem:[#allocation11 + $0xf0] sm:$0xff]  ;;  %v671_v30 = vld [vmem:[#allocation11 + $0xe8] sm:$0xff] }
  0x51   :  { %408 = vmatpush.msrb.mxu2 %v160_v32  ;;  %430 = vmatpush.msrb.mxu3 %v228_v33  ;;  %v652_v29 = vld [vmem:[#allocation11 + $0x50] sm:$0xff] }
  0x52   :  { %363 = vmatpush.msrb.mxu0 %v155_v34  ;;  %385 = vmatpush.msrb.mxu1 %v223_v35 }
  0x53   :  { %409 = vmatpush.msrb.mxu2 %v156_v36  ;;  %431 = vmatpush.msrb.mxu3 %v224_v37  ;;  %v651_v36 = vld [vmem:[#allocation11 + $0x48] sm:$0xff]  ;;  %v670_v37 = vld [vmem:[#allocation11 + $0xe0] sm:$0xff] }
  0x54   :  { %364 = vmatpush.msrb.mxu0 %v151_v38  ;;  %386 = vmatpush.msrb.mxu1 %v219_v39 }
  0x55   :  { %410 = vmatpush.msrb.mxu2 %v152_v40  ;;  %432 = vmatpush.msrb.mxu3 %v220_v41  ;;  %v650_v41 = vld [vmem:[#allocation11 + $0x40] sm:$0xff] }
  0x56   :  { %365 = vmatpush.msrb.mxu0 %v147_v42  ;;  %387 = vmatpush.msrb.mxu1 %v215_v43  ;;  %v669_v42 = vld [vmem:[#allocation11 + $0xd8] sm:$0xff] }
  0x57   :  { %411 = vmatpush.msrb.mxu2 %v148_v44  ;;  %433 = vmatpush.msrb.mxu3 %v216_v45 }
  0x58   :  { %366 = vmatpush.msrb.mxu0 %v143_v46  ;;  %388 = vmatpush.msrb.mxu1 %v211_v47 }
  0x59   :  { %412 = vmatpush.msrb.mxu2 %v144_v48  ;;  %434 = vmatpush.msrb.mxu3 %v212_v49  ;;  %v649_v49 = vld [vmem:[#allocation11 + $0x38] sm:$0xff] }
  0x5a   :  { %367 = vmatpush.msrb.mxu0 %v139_v50  ;;  %389 = vmatpush.msrb.mxu1 %v207_v51  ;;  %v668_v50 = vld [vmem:[#allocation11 + $0xd0] sm:$0xff] }
  0x5b   :  { %413 = vmatpush.msrb.mxu2 %v140_v52  ;;  %435 = vmatpush.msrb.mxu3 %v208_v53 }
  0x5c   :  { %368 = vmatpush.msrb.mxu0 %v135_v54  ;;  %390 = vmatpush.msrb.mxu1 %v203_v55 }
  0x5d   :  { %414 = vmatpush.msrb.mxu2 %v136_v56  ;;  %436 = vmatpush.msrb.mxu3 %v204_v57  ;;  %v648_v56 = vld [vmem:[#allocation11 + $0x30] sm:$0xff]  ;;  %v667_v57 = vld [vmem:[#allocation11 + $0xc8] sm:$0xff] }
  0x5e   :  { %369 = vmatpush.msrb.mxu0 %v131_v58  ;;  %391 = vmatpush.msrb.mxu1 %v199_v59 }
  0x5f   :  { %415 = vmatpush.msrb.mxu2 %v132_v60  ;;  %437 = vmatpush.msrb.mxu3 %v200_v61 }
  0x60   :  { %370 = vmatpush.msrb.mxu0 %v127_v63  ;;  %392 = vmatpush.msrb.mxu1 %v195_v0  ;;  %v647_v63 = vld [vmem:[#allocation11 + $0x28] sm:$0xff]  ;;  %v666_v0 = vld [vmem:[#allocation11 + $0xc0] sm:$0xff] }
  0x61   :  { %416 = vmatpush.msrb.mxu2 %v128_v1  ;;  %438 = vmatpush.msrb.mxu3 %v196_v2 }
  0x62   :  { %371 = vmatmul.f32.vlgmr.msrb.gmra.mxu0 %v1168_v62  ;;  %417 = vmatmul.f32.vlgmr.msrb.gmra.mxu2 %v1168_v62  ;;  %v1095_v62 = vmov 16.0  }
  0x63   :  { %393 = vmatpush.msrb.mxu1 %v191_v4  ;;  %439 = vmatpush.msrb.mxu3 %v192_v5  ;;  %893 = vrcp.f32 %v1095_v62  ;;  %v665_v62 = vld [vmem:[#allocation11 + $0xb8] sm:$0xff] }
  0x64   :  { %394 = vmatmul.f32.vlgmr.msrb.gmra.mxu1 %v1172_v3  ;;  %440 = vmatmul.f32.vlgmr.msrb.gmra.mxu3 %v1172_v3 }
  0x65   :  { %710 = vmatpush.msra.mxu0 %v657_v10  ;;  %733 = vmatpush.msra.mxu1 %v673_v20  ;;  %v663_v20 = vld [vmem:[#allocation11 + $0xa8] sm:$0xff] }
  0x67   :  { %711 = vmatpush.msra.mxu0 %v656_v12  ;;  %734 = vmatpush.msra.mxu1 %v672_v25  ;;  %v645_v12 = vld [vmem:[#allocation11 + $0x18] sm:$0xff]  ;;  %v643_v25 = vld [vmem:[#allocation11 + $0x8] sm:$0xff] }
  0x69   :  { %v1195_v13 = vpop.eup %893  ;;  %712 = vmatpush.msra.mxu0 %v655_v15  ;;  %735 = vmatpush.msra.mxu1 %v671_v30 }
  0x6a   :  { %374 = vmatmul.f32.gmra.mxu0 %v1176_v16  ;;  %420 = vmatmul.f32.gmra.mxu2 %v1176_v16  ;;  %v476_v22 = vmul.f32 16.0, %v1195_v13  ;;  %vm480_vm0 = vweird.f32 %v1195_v13 }
  0x6b   :  { %713 = vmatpush.msra.mxu0 %v654_v19  ;;  %736 = vmatpush.msra.mxu1 %v670_v37 }
  0x6c   :  { %397 = vmatmul.f32.gmra.mxu1 %v1180_v21  ;;  %443 = vmatmul.f32.gmra.mxu3 %v1180_v21  ;;  %v477_v31 = vsub.f32 1.0, %v476_v22 }
  0x6d   :  { %714 = vmatpush.msra.mxu0 %v653_v24  ;;  %737 = vmatpush.msra.mxu1 %v669_v42 }
  0x6e   :  { %v478_v43 = vmul.f32 %v1195_v13, %v477_v31  ;;  %v642_v31 = vld [vmem:[#allocation11] sm:$0xff] }
  0x6f   :  { %715 = vmatpush.msra.mxu0 %v652_v29  ;;  %738 = vmatpush.msra.mxu1 %v668_v50 }
  0x70   :  { %v479_v55 = vadd.f32 %v1195_v13, %v478_v43 }
  0x71   :  { %716 = vmatpush.msra.mxu0 %v651_v36  ;;  %739 = vmatpush.msra.mxu1 %v667_v57  ;;  %v257_v36 = vperm.slane %v1192_v6, 2 }
  0x73   :  { %717 = vmatpush.msra.mxu0 %v650_v41  ;;  %740 = vmatpush.msra.mxu1 %v666_v0 }
  0x75   :  { %718 = vmatpush.msra.mxu0 %v649_v49  ;;  %741 = vmatpush.msra.mxu1 %v665_v62  ;;  %v687_v49 = vld [vmem:[#allocation11 + $0x168] sm:$0xff] }
  0x77   :  { %719 = vmatpush.msra.mxu0 %v648_v56 }
  0x79   :  { %720 = vmatpush.msra.mxu0 %v647_v63 }
  0xbb   :  { %v280_v7 = vpop.f32.mrf.mxu0 }
  0xbc   :  { %v281_v11 = vadd.f32 %v280_v7, %v255_v8  ;;  %v1225_v7 = vsel %vm480_vm0, %v1195_v13, %v479_v55  ;;  %v644_v13 = vld [vmem:[#allocation11 + $0x10] sm:$0xff]  ;;  %v705_v55 = vld [vmem:[#allocation11 + $0x1f8] sm:$0xff] }
  0xbd   :  { %779 = vmatpush.msra.mxu3 %v705_v55 }
  0xbe   :  { %v303_v9 = vpop.f32.mrf.mxu1 }
  0xbf   :  { %v1198_v17 = vadd.f32 %v303_v9, %v281_v11 }
  0xc1   :  { %v326_v3 = vpop.f32.mrf.mxu2  ;;  %v486_v27 = vmul.f32 %v1198_v17, %v1198_v17 }
  0xc2   :  { %v327_v23 = vadd.f32 %v326_v3, %v256_v14 }
  0xc4   :  { %v349_v16 = vpop.f32.mrf.mxu3 }
  0xc5   :  { %v283_v18 = vpop.f32.mrf.mxu0  ;;  %v1205_v32 = vadd.f32 %v349_v16, %v327_v23 }
  0xc6   :  { %v284_v21 = vadd.f32 %v283_v18, %v255_v8  ;;  %v646_v8 = vld [vmem:[#allocation11 + $0x20] sm:$0xff] }
  0xc7   :  { %v487_v45 = vmul.f32 %v1205_v32, %v1205_v32  ;;  %721 = vmatpush.msra.mxu0 %v646_v8 }
  0xc8   :  { %v306_v26 = vpop.f32.mrf.mxu1 }
  0xc9   :  { %v1203_v28 = vadd.f32 %v306_v26, %v284_v21  ;;  %722 = vmatpush.msra.mxu0 %v645_v12  ;;  %v662_v26 = vld [vmem:[#allocation11 + $0xa0] sm:$0xff] }
  0xcb   :  { %v447_v33 = vadd.f32 %v1203_v28, %v1198_v17  ;;  %v490_v34 = vmul.f32 %v1203_v28, %v1203_v28  ;;  %v329_v35 = vpop.f32.mrf.mxu2  ;;  %723 = vmatpush.msra.mxu0 %v644_v13  ;;  %v701_v13 = vld [vmem:[#allocation11 + $0x1d8] sm:$0xff] }
  0xcc   :  { %v330_v38 = vadd.f32 %v329_v35, %v256_v14  ;;  %v664_v14 = vld [vmem:[#allocation11 + $0xb0] sm:$0xff] }
  0xcd   :  { %v448_v39 = vrot.slane %v447_v33, 4  ;;  %v494_v40 = vadd.f32 %v490_v34, %v486_v27  ;;  %742 = vmatpush.msra.mxu1 %v664_v14  ;;  %724 = vmatpush.msra.mxu0 %v643_v25 }
  0xce   :  { %v352_v44 = vpop.f32.mrf.mxu3 }
  0xcf   :  { %v449_v46 = vadd.f32 %v448_v39, %v447_v33  ;;  %v495_v47 = vrot.slane %v494_v40, 4  ;;  %v1214_v48 = vadd.f32 %v352_v44, %v330_v38  ;;  %743 = vmatpush.msra.mxu1 %v663_v20  ;;  %v661_v33 = vld [vmem:[#allocation11 + $0x98] sm:$0xff]  ;;  %725 = vmatpush.msra.mxu0 %v642_v31  ;;  %v688_v44 = vld [vmem:[#allocation11 + $0x170] sm:$0xff] }
  0xd0   :  { %v689_v38 = vld [vmem:[#allocation11 + $0x178] sm:$0xff] }
  0xd1   :  { %v450_v51 = vrot.slane %v449_v46, 2  ;;  %v496_v52 = vadd.f32 %v495_v47, %v494_v40  ;;  %v454_v53 = vadd.f32 %v1214_v48, %v1205_v32  ;;  %v491_v54 = vmul.f32 %v1214_v48, %v1214_v48  ;;  %744 = vmatpush.msra.mxu1 %v662_v26  ;;  %756 = vmatpush.msra.mxu2 %v689_v38  ;;  %v660_v40 = vld [vmem:[#allocation11 + $0x90] sm:$0xff]  ;;  %v681_v26 = vld [vmem:[#allocation11 + $0x138] sm:$0xff] }
  0xd3   :  { %v451_v58 = vadd.f32 %v450_v51, %v449_v46  ;;  %v497_v59 = vrot.slane %v496_v52, 2  ;;  %v455_v60 = vrot.slane %v454_v53, 4  ;;  %v501_v61 = vadd.f32 %v491_v54, %v487_v45  ;;  %745 = vmatpush.msra.mxu1 %v661_v33  ;;  %757 = vmatpush.msra.mxu2 %v688_v44  ;;  %v659_v46 = vld [vmem:[#allocation11 + $0x88] sm:$0xff]  ;;  %v658_v51 = vld [vmem:[#allocation11 + $0x80] sm:$0xff] }
  0xd4   :  { %v686_v54 = vld [vmem:[#allocation11 + $0x160] sm:$0xff] }
  0xd5   :  { %v452_v1 = vrot.slane %v451_v58, 1  ;;  %v498_v2 = vadd.f32 %v497_v59, %v496_v52  ;;  %v456_v4 = vadd.f32 %v455_v60, %v454_v53  ;;  %v502_v5 = vrot.slane %v501_v61, 4  ;;  %746 = vmatpush.msra.mxu1 %v660_v40  ;;  %758 = vmatpush.msra.mxu2 %v687_v49  ;;  %v685_v60 = vld [vmem:[#allocation11 + $0x158] sm:$0xff]  ;;  %v680_v40 = vld [vmem:[#allocation11 + $0x130] sm:$0xff]  ;;  %v698_v49 = vld [vmem:[#allocation11 + $0x1c0] sm:$0xff] }
  0xd6   :  { %v258_v52 = vperm.slane %v1192_v6, 3 }
  0xd7   :  { %v453_v9 = vadd.f32 %v452_v1, %v451_v58  ;;  %v499_v10 = vrot.slane %v498_v2, 1  ;;  %v457_v11 = vrot.slane %v456_v4, 2  ;;  %v503_v3 = vadd.f32 %v502_v5, %v501_v61  ;;  %747 = vmatpush.msra.mxu1 %v659_v46  ;;  %759 = vmatpush.msra.mxu2 %v686_v54  ;;  %v704_v61 = vld [vmem:[#allocation11 + $0x1f0] sm:$0xff]  ;;  %v703_v5 = vld [vmem:[#allocation11 + $0x1e8] sm:$0xff]  ;;  %v697_v54 = vld [vmem:[#allocation11 + $0x1b8] sm:$0xff] }
  0xd8   :  { %780 = vmatpush.msra.mxu3 %v704_v61 }
  0xd9   :  { %v1228_v15 = vmul.f32 %v1225_v7, %v453_v9  ;;  %v500_v16 = vadd.f32 %v499_v10, %v498_v2  ;;  %v458_v18 = vadd.f32 %v457_v11, %v456_v4  ;;  %v504_v19 = vrot.slane %v503_v3, 2  ;;  %748 = vmatpush.msra.mxu1 %v658_v51  ;;  %760 = vmatpush.msra.mxu2 %v685_v60  ;;  %v684_v4 = vld [vmem:[#allocation11 + $0x150] sm:$0xff]  ;;  %v683_v10 = vld [vmem:[#allocation11 + $0x148] sm:$0xff]  ;;  %v702_v11 = vld [vmem:[#allocation11 + $0x1e0] sm:$0xff] }
  0xda   :  { %781 = vmatpush.msra.mxu3 %v703_v5 }
  0xdb   :  { %v522_v21 = vmul.f32 %v500_v16, %v1225_v7  ;;  %v526_v22 = vmul.f32 %v1228_v15, %v1228_v15  ;;  %v459_v23 = vrot.slane %v458_v18, 1  ;;  %v505_v24 = vadd.f32 %v504_v19, %v503_v3  ;;  %761 = vmatpush.msra.mxu2 %v684_v4  ;;  %v682_v19 = vld [vmem:[#allocation11 + $0x140] sm:$0xff] }
  0xdc   :  { %782 = vmatpush.msra.mxu3 %v702_v11  ;;  %v542_v60 = vsub.f32 %v1203_v28, %v1228_v15 }
  0xdd   :  { %v530_v27 = vsub.f32 %v522_v21, %v526_v22  ;;  %v460_v29 = vadd.f32 %v459_v23, %v458_v18  ;;  %v506_v30 = vrot.slane %v505_v24, 1  ;;  %762 = vmatpush.msra.mxu2 %v683_v10 }
  0xde   :  { %783 = vmatpush.msra.mxu3 %v701_v13 }
  0xdf   :  { %v534_v34 = vmax.f32 %v530_v27, 0.0  ;;  %v1234_v35 = vmul.f32 %v1225_v7, %v460_v29  ;;  %v372_v37 = vpop.f32.mrf.mxu0  ;;  %v507_v39 = vadd.f32 %v506_v30, %v505_v24  ;;  %v1264_v24 = vld [vmem:[#allocation8] sm:$0xf]  ;;  %763 = vmatpush.msra.mxu2 %v682_v19  ;;  %v700_v27 = vld [vmem:[#allocation11 + $0x1d0] sm:$0xff] }
  0xe0   :  { %v373_v47 = vadd.f32 %v372_v37, %v257_v36  ;;  %784 = vmatpush.msra.mxu3 %v700_v27  ;;  %v601_v28 = vperm.slane %v1264_v24, 1 }
  0xe1   :  { %v1237_v41 = vadd.f32 1e-05, %v534_v34  ;;  %v527_v42 = vmul.f32 %v1234_v35, %v1234_v35  ;;  %v395_v43 = vpop.f32.mrf.mxu1  ;;  %v523_v45 = vmul.f32 %v507_v39, %v1225_v7  ;;  %764 = vmatpush.msra.mxu2 %v681_v26  ;;  %v600_v39 = vperm.slane %v1264_v24, 0 }
  0xe2   :  { %v1244_v57 = vadd.f32 %v395_v43, %v373_v47  ;;  %v679_v47 = vld [vmem:[#allocation11 + $0x128] sm:$0xff] }
  0xe3   :  { %895 = vrsqrt.f32 %v1237_v41  ;;  %v531_v50 = vsub.f32 %v523_v45, %v527_v42  ;;  %v699_v42 = vld [vmem:[#allocation11 + $0x1c8] sm:$0xff]  ;;  %765 = vmatpush.msra.mxu2 %v680_v40  ;;  %vm556_vm2 = vweird.f32 %v1237_v41 }
  0xe4   :  { %v488_v9 = vmul.f32 %v1244_v57, %v1244_v57  ;;  %785 = vmatpush.msra.mxu3 %v699_v42 }
  0xe5   :  { %v418_v53 = vpop.f32.mrf.mxu2  ;;  %v535_v56 = vmax.f32 %v531_v50, 0.0  ;;  %766 = vmatpush.msra.mxu2 %v679_v47 }
  0xe6   :  { %v419_v6 = vadd.f32 %v418_v53, %v258_v52  ;;  %v678_v53 = vld [vmem:[#allocation11 + $0x120] sm:$0xff]  ;;  %786 = vmatpush.msra.mxu3 %v698_v49  ;;  %v692_v49 = vld [vmem:[#allocation11 + $0x190] sm:$0xff] }
  0xe7   :  { %v375_v58 = vpop.f32.mrf.mxu0  ;;  %v441_v59 = vpop.f32.mrf.mxu3  ;;  %v1246_v63 = vadd.f32 1e-05, %v535_v56  ;;  %767 = vmatpush.msra.mxu2 %v678_v53 }
  0xe8   :  { %v376_v0 = vadd.f32 %v375_v58, %v257_v36  ;;  %v1262_v16 = vadd.f32 %v441_v59, %v419_v6  ;;  %v1270_v36 = vld [vmem:[#allocation10] sm:$0xf]  ;;  %787 = vmatpush.msra.mxu3 %v697_v54 }
  0xe9   :  { %v1248_v1 = vpop.eup %895  ;;  %v398_v2 = vpop.f32.mrf.mxu1  ;;  %897 = vrsqrt.f32 %v1246_v63  ;;  %v618_v51 = vperm.slane %v1270_v36, 0  ;;  %v677_v6 = vld [vmem:[#allocation11 + $0x118] sm:$0xff]  ;;  %vm566_vm5 = vweird.f32 %v1246_v63 }
  0xea   :  { %v551_v8 = vmul.f32 %v1248_v1, %v1237_v41  ;;  %v1253_v62 = vadd.f32 %v398_v2, %v376_v0  ;;  %v489_v38 = vmul.f32 %v1262_v16, %v1262_v16  ;;  %vm557_vm1 = vweird.f32 %v1248_v1  ;;  %v696_v2 = vld [vmem:[#allocation11 + $0x1b0] sm:$0xff]  ;;  %768 = vmatpush.msra.mxu2 %v677_v6 }
  0xeb   :  { %vm558_vm3 = vmor %vm556_vm2, %vm557_vm1  ;;  %v538_v41 = vsub.f32 %v1198_v17, %v1228_v15  ;;  %788 = vmatpush.msra.mxu3 %v696_v2 }
  0xec   :  { %v461_v3 = vadd.f32 %v1253_v62, %v1244_v57  ;;  %v492_v12 = vmul.f32 %v1253_v62, %v1253_v62  ;;  %v552_v14 = vmul.f32 %v1248_v1, %v551_v8 }
  0xed   :  { %v421_v18 = vpop.f32.mrf.mxu2 }
  0xee   :  { %v462_v20 = vrot.slane %v461_v3, 4  ;;  %v508_v21 = vadd.f32 %v492_v12, %v488_v9  ;;  %v422_v22 = vadd.f32 %v421_v18, %v258_v52  ;;  %v553_v23 = vmul.f32 0.5, %v552_v14  ;;  %v695_v12 = vld [vmem:[#allocation11 + $0x1a8] sm:$0xff] }
  0xef   :  { %v444_v25 = vpop.f32.mrf.mxu3  ;;  %v1266_v29 = vpop.eup %897  ;;  %789 = vmatpush.msra.mxu3 %v695_v12 }
  0xf0   :  { %v463_v30 = vadd.f32 %v462_v20, %v461_v3  ;;  %v509_v31 = vrot.slane %v508_v21, 4  ;;  %v1268_v33 = vadd.f32 %v444_v25, %v422_v22  ;;  %v554_v34 = vsub.f32 1.5, %v553_v23  ;;  %v676_v3 = vld [vmem:[#allocation11 + $0x110] sm:$0xff]  ;;  %v675_v20 = vld [vmem:[#allocation11 + $0x108] sm:$0xff] }
  0xf1   :  { %v561_v37 = vmul.f32 %v1266_v29, %v1246_v63  ;;  %vm567_vm4 = vweird.f32 %v1266_v29  ;;  %769 = vmatpush.msra.mxu2 %v676_v3  ;;  %v539_v63 = vsub.f32 %v1205_v32, %v1234_v35 }
  0xf2   :  { %v464_v43 = vrot.slane %v463_v30, 2  ;;  %v510_v44 = vadd.f32 %v509_v31, %v508_v21  ;;  %v468_v45 = vadd.f32 %v1268_v33, %v1262_v16  ;;  %v493_v46 = vmul.f32 %v1268_v33, %v1268_v33  ;;  %v694_v21 = vld [vmem:[#allocation11 + $0x1a0] sm:$0xff]  ;;  %vm568_vm6 = vmor %vm566_vm5, %vm567_vm4 }
  0xf3   :  { %v555_v50 = vmul.f32 %v1248_v1, %v554_v34  ;;  %v562_v52 = vmul.f32 %v1266_v29, %v561_v37  ;;  %v619_v31 = vperm.slane %v1270_v36, 1  ;;  %v674_v34 = vld [vmem:[#allocation11 + $0x100] sm:$0xff]  ;;  %v693_v37 = vld [vmem:[#allocation11 + $0x198] sm:$0xff]  ;;  %770 = vmatpush.msra.mxu2 %v675_v20  ;;  %790 = vmatpush.msra.mxu3 %v694_v21  ;;  %v620_v21 = vperm.slane %v1270_v36, 2 }
  0xf4   :  { %v465_v55 = vadd.f32 %v464_v43, %v463_v30  ;;  %v511_v56 = vrot.slane %v510_v44, 2  ;;  %v469_v58 = vrot.slane %v468_v45, 4  ;;  %v515_v59 = vadd.f32 %v493_v46, %v489_v38 }
  0xf5   :  { %v559_v61 = vsel %vm558_vm3, %v1248_v1, %v555_v50  ;;  %v563_v0 = vmul.f32 0.5, %v562_v52  ;;  %v543_v38 = vsub.f32 %v1214_v48, %v1234_v35  ;;  %771 = vmatpush.msra.mxu2 %v674_v34  ;;  %791 = vmatpush.msra.mxu3 %v693_v37  ;;  %v691_v52 = vld [vmem:[#allocation11 + $0x188] sm:$0xff] }
  0xf6   :  { %v466_v4 = vrot.slane %v465_v55, 1  ;;  %v512_v5 = vadd.f32 %v511_v56, %v510_v44  ;;  %v470_v8 = vadd.f32 %v469_v58, %v468_v45  ;;  %v516_v9 = vrot.slane %v515_v59, 4 }
  0xf7   :  { %v590_v10 = vmul.f32 %v559_v61, %v538_v41  ;;  %v564_v11 = vsub.f32 1.5, %v563_v0  ;;  %v594_v13 = vmul.f32 %v559_v61, %v542_v60  ;;  %792 = vmatpush.msra.mxu3 %v692_v49 }
  0xf8   :  { %v467_v17 = vadd.f32 %v466_v4, %v465_v55  ;;  %v513_v15 = vrot.slane %v512_v5, 1  ;;  %v471_v1 = vrot.slane %v470_v8, 2  ;;  %v517_v14 = vadd.f32 %v516_v9, %v515_v59 }
  0xf9   :  { %v608_v18 = vmul.f32 %v600_v39, %v590_v10  ;;  %v565_v19 = vmul.f32 %v1266_v29, %v564_v11  ;;  %793 = vmatpush.msra.mxu3 %v691_v52 }
  0xfa   :  { %v1300_v22 = vmul.f32 %v1225_v7, %v467_v17  ;;  %v514_v23 = vadd.f32 %v513_v15, %v512_v5  ;;  %v472_v25 = vadd.f32 %v471_v1, %v470_v8  ;;  %v518_v26 = vrot.slane %v517_v14, 2 }
  0xfb   :  { %v626_v27 = vadd.f32 %v618_v51, %v608_v18  ;;  %v569_v30 = vsel %vm568_vm6, %v1266_v29, %v565_v19  ;;  %v612_v29 = vmul.f32 %v600_v39, %v594_v13  ;;  %v690_v39 = vld [vmem:[#allocation11 + $0x180] sm:$0xff] }
  0xfc   :  { %v524_v40 = vmul.f32 %v514_v23, %v1225_v7  ;;  %v528_v42 = vmul.f32 %v1300_v22, %v1300_v22  ;;  %v473_v43 = vrot.slane %v472_v25, 1  ;;  %v519_v44 = vadd.f32 %v518_v26, %v517_v14  ;;  %794 = vmatpush.msra.mxu3 %v690_v39 }
  0xfd   :  { %v634_v45 = vmax.f32 %v626_v27, 0.0  ;;  %v591_v32 = vmul.f32 %v569_v30, %v539_v63  ;;  %v595_v50 = vmul.f32 %v569_v30, %v543_v38  ;;  %v630_v58 = vadd.f32 %v618_v51, %v612_v29 }
  0xfe   :  { %v532_v46 = vsub.f32 %v524_v40, %v528_v42  ;;  %v474_v47 = vadd.f32 %v473_v43, %v472_v25  ;;  %v520_v48 = vrot.slane %v519_v44, 1  ;;  %v540_v1 = vsub.f32 %v1244_v57, %v1300_v22 }
  0xff   :  { %726 = vmatmul.f32.vlgmr.msra.gmra.mxu0 %v634_v45  ;;  %v609_v35 = vmul.f32 %v601_v28, %v591_v32  ;;  %v613_v0 = vmul.f32 %v601_v28, %v595_v50  ;;  %v638_v2 = vmax.f32 %v630_v58, 0.0  ;;  %v602_v14 = vperm.slane %v1264_v24, 2 }
 0x100   :  { %v536_v53 = vmax.f32 %v532_v46, 0.0  ;;  %v485_v54 = vmul.f32 %v1225_v7, %v474_v47  ;;  %v521_v55 = vadd.f32 %v520_v48, %v519_v44  ;;  %v544_v13 = vsub.f32 %v1253_v62, %v1300_v22 }
 0x101   :  { %v627_v56 = vadd.f32 %v619_v31, %v609_v35  ;;  %v631_v5 = vadd.f32 %v619_v31, %v613_v0  ;;  %v603_v31 = vperm.slane %v1264_v24, 3  ;;  %v621_v40 = vperm.slane %v1270_v36, 3 }
 0x102   :  { %v548_v59 = vadd.f32 1e-05, %v536_v53  ;;  %v529_v60 = vmul.f32 %v485_v54, %v485_v54  ;;  %v525_v41 = vmul.f32 %v521_v55, %v1225_v7  ;;  %v541_v57 = vsub.f32 %v1262_v16, %v485_v54 }
 0x103   :  { %v635_v61 = vmax.f32 %v627_v56, 0.0  ;;  %v639_v51 = vmax.f32 %v631_v5, 0.0  ;;  %v545_v62 = vsub.f32 %v1268_v33, %v485_v54  ;;  %v890_v33 = vld [vmem:[%s1354_s6] ss:$0 sm:$0xff] }
 0x104   :  { %899 = vrsqrt.f32 %v548_v59  ;;  %v533_v6 = vsub.f32 %v525_v41, %v529_v60  ;;  %vm576_vm8 = vweird.f32 %v548_v59 }
 0x105   :  { %749 = vmatmul.f32.vlgmr.msra.gmra.mxu1 %v635_v61 }
 0x106   :  { %v537_v4 = vmax.f32 %v533_v6, 0.0 }
 0x107   :  { %729 = vmatmul.f32.gmra.mxu0 %v638_v2 }
 0x108   :  { %v549_v8 = vadd.f32 1e-05, %v537_v4 }
 0x10a   :  { %v900_v9 = vpop.eup %899  ;;  %901 = vrsqrt.f32 %v549_v8  ;;  %vm586_vm11 = vweird.f32 %v549_v8 }
 0x10b   :  { %v571_v10 = vmul.f32 %v900_v9, %v548_v59  ;;  %vm577_vm7 = vweird.f32 %v900_v9 }
 0x10c   :  { %vm578_vm9 = vmor %vm576_vm8, %vm577_vm7 }
 0x10d   :  { %752 = vmatmul.f32.gmra.mxu1 %v639_v51  ;;  %v572_v11 = vmul.f32 %v900_v9, %v571_v10 }
 0x10f   :  { %v573_v3 = vmul.f32 0.5, %v572_v11 }
 0x110   :  { %v902_v12 = vpop.eup %901 }
 0x111   :  { %v574_v17 = vsub.f32 1.5, %v573_v3  ;;  %v581_v28 = vmul.f32 %v902_v12, %v549_v8  ;;  %vm587_vm10 = vweird.f32 %v902_v12 }
 0x112   :  { %vm588_vm12 = vmor %vm586_vm11, %vm587_vm10 }
 0x113   :  { %v575_v15 = vmul.f32 %v900_v9, %v574_v17  ;;  %v582_v18 = vmul.f32 %v902_v12, %v581_v28 }
 0x115   :  { %v579_v19 = vsel %vm578_vm9, %v900_v9, %v575_v15  ;;  %v583_v23 = vmul.f32 0.5, %v582_v18 }
 0x116   :  { %v592_v20 = vmul.f32 %v579_v19, %v540_v1  ;;  %v596_v27 = vmul.f32 %v579_v19, %v544_v13 }
 0x117   :  { %v584_v26 = vsub.f32 1.5, %v583_v23 }
 0x118   :  { %v610_v25 = vmul.f32 %v602_v14, %v592_v20  ;;  %v614_v38 = vmul.f32 %v602_v14, %v596_v27 }
 0x119   :  { %v585_v30 = vmul.f32 %v902_v12, %v584_v26 }
 0x11a   :  { %v628_v63 = vadd.f32 %v620_v21, %v610_v25  ;;  %v632_v44 = vadd.f32 %v620_v21, %v614_v38  ;;  %v892_v38 = vld [vmem:[%s1356_s8] ss:$0 sm:$0xff] }
 0x11b   :  { %v589_v37 = vsel %vm588_vm12, %v902_v12, %v585_v30 }
 0x11c   :  { %v636_v34 = vmax.f32 %v628_v63, 0.0  ;;  %v593_v22 = vmul.f32 %v589_v37, %v541_v57  ;;  %v597_v43 = vmul.f32 %v589_v37, %v545_v62  ;;  %v640_v46 = vmax.f32 %v632_v44, 0.0 }
 0x11e   :  { %772 = vmatmul.f32.vlgmr.msra.gmra.mxu2 %v636_v34  ;;  %v611_v42 = vmul.f32 %v603_v31, %v593_v22  ;;  %v615_v29 = vmul.f32 %v603_v31, %v597_v43 }
 0x120   :  { %v629_v45 = vadd.f32 %v621_v40, %v611_v42  ;;  %v633_v16 = vadd.f32 %v621_v40, %v615_v29 }
 0x122   :  { %v637_v32 = vmax.f32 %v629_v45, 0.0  ;;  %v641_v24 = vmax.f32 %v633_v16, 0.0 }
 0x124   :  { %795 = vmatmul.f32.vlgmr.msra.gmra.mxu3 %v637_v32 }
 0x126   :  { %775 = vmatmul.f32.gmra.mxu2 %v640_v46 }
 0x12c   :  { %798 = vmatmul.f32.gmra.mxu3 %v641_v24 }
 0x17c   :  { %v727_v47 = vpop.f32.mrf.mxu0 }
 0x17d   :  { %v728_v50 = vadd.f32 %v890_v33, %v727_v47 }
 0x182   :  { %v750_v49 = vpop.f32.mrf.mxu1 }
 0x183   :  { %v751_v53 = vadd.f32 %v750_v49, %v728_v50 }
 0x184   :  { %v730_v36 = vpop.f32.mrf.mxu0 }
 0x185   :  { %v731_v54 = vadd.f32 %v890_v33, %v730_v36 }
 0x18a   :  { %v753_v52 = vpop.f32.mrf.mxu1 }
 0x18b   :  { %v754_v56 = vadd.f32 %v753_v52, %v731_v54 }
 0x1a1   :  { %v773_v48 = vpop.f32.mrf.mxu2 }
 0x1a2   :  { %v774_v58 = vadd.f32 %v773_v48, %v751_v53 }
 0x1a7   :  { %v796_v35 = vpop.f32.mrf.mxu3 }
 0x1a8   :  { %v797_v39 = vadd.f32 %v796_v35, %v774_v58 }
 0x1a9   :  { %v776_v55 = vpop.f32.mrf.mxu2 }
 0x1aa   :  { %v777_v59 = vadd.f32 %v776_v55, %v754_v56  ;;  %v810_v61 = vmul.f32 %v797_v39, %v797_v39 }
 0x1af   :  { %v799_v60 = vpop.f32.mrf.mxu3 }
 0x1b0   :  { %v800_v41 = vadd.f32 %v799_v60, %v777_v59 }
 0x1b2   :  { %v802_v0 = vadd.f32 %v800_v41, %v797_v39  ;;  %v811_v6 = vmul.f32 %v800_v41, %v800_v41 }
 0x1b4   :  { %v803_v2 = vrot.slane %v802_v0, 4  ;;  %v812_v4 = vadd.f32 %v811_v6, %v810_v61 }
 0x1b6   :  { %v804_v5 = vadd.f32 %v803_v2, %v802_v0  ;;  %v813_v8 = vrot.slane %v812_v4, 4 }
 0x1b8   :  { %v805_v9 = vrot.slane %v804_v5, 2  ;;  %v814_v10 = vadd.f32 %v813_v8, %v812_v4 }
 0x1ba   :  { %v806_v51 = vadd.f32 %v805_v9, %v804_v5  ;;  %v815_v11 = vrot.slane %v814_v10, 2 }
 0x1bc   :  { %v807_v3 = vrot.slane %v806_v51, 1  ;;  %v816_v12 = vadd.f32 %v815_v11, %v814_v10 }
 0x1be   :  { %v808_v17 = vadd.f32 %v807_v3, %v806_v51  ;;  %v817_v28 = vrot.slane %v816_v12, 1 }
 0x1c0   :  { %v809_v15 = vmul.f32 %v808_v17, %v1225_v7  ;;  %v818_v1 = vadd.f32 %v817_v28, %v816_v12 }
 0x1c2   :  { %v819_v14 = vmul.f32 %v818_v1, %v1225_v7  ;;  %v820_v18 = vmul.f32 %v809_v15, %v809_v15  ;;  %v823_v30 = vsub.f32 %v797_v39, %v809_v15  ;;  %v824_v57 = vsub.f32 %v800_v41, %v809_v15  ;;  %v891_v7 = vld [vmem:[%s1355_s7] ss:$0 sm:$0xff] }
 0x1c4   :  { %v821_v19 = vsub.f32 %v819_v14, %v820_v18 }
 0x1c6   :  { %v822_v13 = vmax.f32 %v821_v19, 0.0 }
 0x1c8   :  { %v825_v20 = vadd.f32 1e-05, %v822_v13 }
 0x1ca   :  { %903 = vrsqrt.f32 %v825_v20  ;;  %vm832_vm14 = vweird.f32 %v825_v20 }
 0x1d0   :  { %v904_v21 = vpop.eup %903 }
 0x1d1   :  { %v827_v23 = vmul.f32 %v904_v21, %v825_v20  ;;  %vm833_vm13 = vweird.f32 %v904_v21 }
 0x1d2   :  { %vm834_vm15 = vmor %vm832_vm14, %vm833_vm13 }
 0x1d3   :  { %v828_v25 = vmul.f32 %v904_v21, %v827_v23 }
 0x1d5   :  { %v829_v26 = vmul.f32 0.5, %v828_v25 }
 0x1d7   :  { %v830_v27 = vsub.f32 1.5, %v829_v26 }
 0x1d9   :  { %v831_v63 = vmul.f32 %v904_v21, %v830_v27 }
 0x1db   :  { %v835_v31 = vsel %vm834_vm15, %v904_v21, %v831_v63 }
 0x1dc   :  { %v836_v34 = vmul.f32 %v835_v31, %v823_v30  ;;  %v837_v37 = vmul.f32 %v835_v31, %v824_v57 }
 0x1de   :  { %v843_v62 = vmul.f32 %v891_v7, %v837_v37  ;;  %v842_v22 = vmul.f32 %v891_v7, %v836_v34 }
 0x1e0   :  { %v848_v40 = vadd.f32 %v892_v38, %v842_v22  ;;  %v849_v42 = vadd.f32 %v892_v38, %v843_v62 }
 0x1e2   :  { %v850_v43 = vmax.f32 %v848_v40, 0.0  ;;  %v851_v44 = vmax.f32 %v849_v42, 0.0 }
 0x1e4   :  { %852 = vst [vmem:[#allocation13] sm:$0xff] %v850_v43 }
 0x1e5   :  { %853 = vst [vmem:[#allocation13 + $0x8] sm:$0xff] %v851_v44 }
 0x1e6   :  { %866 = dma.vmem_to_hbm [thread:$0]  %s859_s1, 256, %s861_s26, [#allocation4], %s1093_s18, %s1093_s18, %s1094_s19  }
 0x1e7   :  { %1081 = dma.done.wait [#allocation4], 256  }
 0x1e8   :  { %1082 = vsyncadd [#allocation4], 4294967040 }
 0x1e9   :  { %871 = vsyncpa [#allocation3], 1 }
 0x1ea   :  { %872 = vsyncpa [#allocation6], 1 }
 0x1eb   :  { %873 = vsyncpa [#allocation9], 1 }
 0x1ec   :  { %874 = vsyncpa [#allocation12], 1 }
 0x1ed   :  { %875 = vsyncpa [#allocation4], 1 }

</bundles_post_ra>
